<compile_context>
chip_gen: v5e
topology: v5e:2x2
jax: 0.10.0
libtpu: 0.0.40
codegen_flags: <defaults>
</compile_context>

<pallas_src>
import jax
import jax.numpy as jnp
from jax.experimental import pallas as pl
from jax.experimental.pallas import tpu as pltpu


def _conv1x1_kernel(x_ref, w_ref, b_ref, o_ref):
    # x_ref: (1, C_in, TS)  w_ref: (TC, C_in)  b_ref: (TC, 1)  o_ref: (1, TC, TS)
    acc = jnp.dot(w_ref[...], x_ref[0], preferred_element_type=jnp.float32)
    # Bias add / cast in f32 (cheap epilogue even on v5e's f32-only VPU).
    o_ref[0] = (acc + b_ref[...].astype(jnp.float32)).astype(o_ref.dtype)


def _choose_spatial_tile(S, c_in, tc_out, itemsize):
    """Largest lane-dense spatial tile that fits a conservative VMEM budget."""
    # Double-buffered streaming blocks: x block (c_in, ts) + out block (tc_out, ts).
    budget = 8 * 1024 * 1024            # fits default scoped VMEM on v5e/v6e/v7x
    per_col = 2 * (c_in + tc_out) * itemsize
    max_ts = max(128, (budget // per_col) // 128 * 128)
    max_ts = min(max_ts, 2048)          # per-step overhead already amortized >= ~512
    if S <= max_ts:
        return S                        # single full-extent block (always legal)
    return max_ts                       # multiple of 128; tail block masked by Pallas


def _conv1x1(x3, weight, bias_col, *, tile_s=None):
    """x3: [N, C_in, S], weight: [C_out, C_in], bias_col: [C_out, 1] -> [N, C_out, S]."""
    N, C_in, S = x3.shape
    C_out = weight.shape[0]

    # Tile C_out only when it is large; the kernel body is tile-size agnostic.
    # TODO(synk): for very large C_in add a reduction grid axis with a VMEM
    # accumulator (pl.when init/finalize) instead of a full-C_in weight block.
    tc = C_out if C_out <= 512 else 256
    ts = tile_s if tile_s is not None else _choose_spatial_tile(
        S, C_in, tc, x3.dtype.itemsize)

    grid = (N, pl.cdiv(C_out, tc), pl.cdiv(S, ts))

    flops = 2 * N * S * C_in * C_out
    bytes_accessed = (
        x3.size * x3.dtype.itemsize
        + weight.size * weight.dtype.itemsize
        + bias_col.size * bias_col.dtype.itemsize
        + N * C_out * S * x3.dtype.itemsize
    )

    return pl.pallas_call(
        _conv1x1_kernel,
        out_shape=jax.ShapeDtypeStruct((N, C_out, S), x3.dtype),
        grid_spec=pltpu.PrefetchScalarGridSpec(
            num_scalar_prefetch=0,
            grid=grid,
            in_specs=[
                pl.BlockSpec((1, C_in, ts), lambda n, co, j: (n, 0, j)),
                pl.BlockSpec((tc, C_in), lambda n, co, j: (co, 0)),
                pl.BlockSpec((tc, 1), lambda n, co, j: (co, 0)),
            ],
            out_specs=pl.BlockSpec((1, tc, ts), lambda n, co, j: (n, co, j)),
        ),
        compiler_params=pltpu.CompilerParams(
            dimension_semantics=("parallel", "parallel", "parallel"),
            # Explicit limit with headroom: <= v7x 64 MiB physical, well under
            # v5e/v6e 128 MiB; our blocks budget ~8 MiB of streaming buffers.
            vmem_limit_bytes=48 * 1024 * 1024,
        ),
        cost_estimate=pl.CostEstimate(
            flops=flops, transcendentals=0, bytes_accessed=bytes_accessed),
    )(x3, weight, bias_col)


class SingleOutConv:
    """JAX/Pallas port of the PyTorch SingleOutConv (kernel_size=1 conv)."""

    def __init__(self, in_channels, out_channels, dim, key=None, dtype=jnp.float32):
        assert dim == 1 or dim == 2
        self.dim = dim
        self.in_channels = in_channels
        self.out_channels = out_channels
        if key is None:
            key = jax.random.PRNGKey(0)
        kw, kb = jax.random.split(key)
        # PyTorch Conv default init: uniform +/- 1/sqrt(fan_in), fan_in = C_in * 1.
        bound = 1.0 / (in_channels ** 0.5)
        # Weight stored directly in the [C_out, C_in] layout the kernel consumes.
        self.weight = jax.random.uniform(
            kw, (out_channels, in_channels), dtype=dtype, minval=-bound, maxval=bound)
        self.bias = jax.random.uniform(
            kb, (out_channels,), dtype=dtype, minval=-bound, maxval=bound)
        # Precompute the (C_out, 1) bias column once (no per-call reshape op).
        self.bias_col = self.bias.reshape(out_channels, 1)

    def __call__(self, x):
        if self.dim == 2:
            # x: [N, C_in, H, W]  (PyTorch NCHW) — reshape only, no transpose.
            N, C, H, W = x.shape
            assert C == self.in_channels
            y3 = _conv1x1(x.reshape(N, C, H * W), self.weight, self.bias_col)
            return y3.reshape(N, self.out_channels, H, W)
        else:
            # x: [N, C_in, L]  (PyTorch NCL) — already in kernel layout.
            N, C, L = x.shape
            assert C == self.in_channels
            return _conv1x1(x, self.weight, self.bias_col)


def _reference(x, weight, bias, dim):
    """Pure-JAX reference of the 1x1 conv for correctness checking."""
    if dim == 2:
        return jnp.einsum("oc,nchw->nohw", weight, x) + bias[None, :, None, None]
    return jnp.einsum("oc,ncl->nol", weight, x) + bias[None, :, None]


if __name__ == "__main__":
    key = jax.random.PRNGKey(0)
    kx2, kx1, kx3, kmod = jax.random.split(key, 4)

    # ---- dim=2 (Conv2d, kernel_size=1), NCHW ----
    N, C_in, H, W = 2, 4, 16, 16
    C_out = 8
    x = jax.random.normal(kx2, (N, C_in, H, W), dtype=jnp.float32)
    mod2 = SingleOutConv(C_in, C_out, dim=2, key=kmod)
    y2 = jax.block_until_ready(mod2(x))
    ref2 = _reference(x, mod2.weight, mod2.bias, dim=2)
    assert y2.shape == (N, C_out, H, W)
    assert jnp.allclose(y2, ref2, atol=1e-5, rtol=1e-5)

    # ---- dim=1 (Conv1d, kernel_size=1), NCL ----
    L = 32
    x1 = jax.random.normal(kx1, (N, C_in, L), dtype=jnp.float32)
    mod1 = SingleOutConv(C_in, C_out, dim=1, key=kmod)
    y1 = jax.block_until_ready(mod1(x1))
    ref1 = _reference(x1, mod1.weight, mod1.bias, dim=1)
    assert y1.shape == (N, C_out, L)
    assert jnp.allclose(y1, ref1, atol=1e-5, rtol=1e-5)

    # ---- boundary-block path: spatial not a multiple of the (forced) tile ----
    L3 = 200
    x3 = jax.random.normal(kx3, (N, C_in, L3), dtype=jnp.float32)
    y3 = jax.block_until_ready(_conv1x1(x3, mod1.weight, mod1.bias_col, tile_s=128))
    ref3 = _reference(x3, mod1.weight, mod1.bias, dim=1)
    assert y3.shape == (N, C_out, L3)
    assert jnp.allclose(y3, ref3, atol=1e-5, rtol=1e-5)

    print("KERNEL_OK")
</pallas_src>

<mosaic_0001>
module attributes {stable_mosaic.version = 11 : i64} {
  func.func @_conv1x1_kernel(%arg0: i32, %arg1: i32, %arg2: i32, %arg3: memref<1x4x256xf32, #tpu.memory_space<vmem>>, %arg4: memref<8x4xf32, #tpu.memory_space<vmem>>, %arg5: memref<8x1xf32, #tpu.memory_space<vmem>>, %arg6: memref<1x8x256xf32, #tpu.memory_space<vmem>>) attributes {dimension_semantics = [#tpu.dimension_semantics<parallel>, #tpu.dimension_semantics<parallel>, #tpu.dimension_semantics<parallel>], iteration_bounds = array<i64: 2, 1, 1>, scalar_prefetch = 0 : i64, scratch_operands = 0 : i64, tpu.core_type = #tpu.core_type<tc>, window_params = [{transform_indices = @transform_0, window_bounds = array<i64: 1, 4, 256>}, {transform_indices = @transform_1, window_bounds = array<i64: 8, 4>}, {transform_indices = @transform_2, window_bounds = array<i64: 8, 1>}, {transform_indices = @transform_3, window_bounds = array<i64: 1, 8, 256>}]} {
    %c0 = arith.constant 0 : index
    %c0_0 = arith.constant 0 : index
    %0 = vector.load %arg4[%c0, %c0_0] : memref<8x4xf32, #tpu.memory_space<vmem>>, vector<8x4xf32>
    %c0_1 = arith.constant 0 : index
    %c0_2 = arith.constant 0 : index
    %c0_3 = arith.constant 0 : index
    %1 = vector.load %arg3[%c0_1, %c0_2, %c0_3] : memref<1x4x256xf32, #tpu.memory_space<vmem>>, vector<1x4x256xf32>
    %2 = vector.shape_cast %1 : vector<1x4x256xf32> to vector<4x256xf32>
    %cst = arith.constant dense<0.000000e+00> : vector<8x256xf32>
    %3 = tpu.matmul %0, %2, %cst {dimension_numbers = #tpu.dot_dimension_numbers<[1], [0], [0], [1], [0, 0, 1, 1], [], []>} : vector<8x4xf32>, vector<4x256xf32>, vector<8x256xf32> -> vector<8x256xf32>
    %c0_4 = arith.constant 0 : index
    %c0_5 = arith.constant 0 : index
    %4 = vector.load %arg5[%c0_4, %c0_5] : memref<8x1xf32, #tpu.memory_space<vmem>>, vector<8x1xf32>
    %5 = vector.broadcast %4 : vector<8x1xf32> to vector<8x256xf32>
    %6 = arith.addf %3, %5 : vector<8x256xf32>
    %c0_6 = arith.constant 0 : index
    %c0_7 = arith.constant 0 : index
    %c0_8 = arith.constant 0 : index
    %7 = vector.load %arg6[%c0_6, %c0_7, %c0_8] : memref<1x8x256xf32, #tpu.memory_space<vmem>>, vector<1x8x256xf32>
    %8 = vector.shape_cast %7 : vector<1x8x256xf32> to vector<8x256xf32>
    %9 = vector.shape_cast %6 : vector<8x256xf32> to vector<1x8x256xf32>
    tpu.vector_store %arg6[%c0_6, %c0_7, %c0_8], %9 {strides = array<i32>} : memref<1x8x256xf32, #tpu.memory_space<vmem>>, vector<1x8x256xf32>,
    return
  }
  func.func @transform_0(%arg0: i32, %arg1: i32, %arg2: i32) -> (i32, i32, i32) {
    %c0_i32 = arith.constant 0 : i32
    %c0_i32_0 = arith.constant 0 : i32
    return %arg0, %c0_i32, %arg2 : i32, i32, i32
  }
  func.func @transform_1(%arg0: i32, %arg1: i32, %arg2: i32) -> (i32, i32) {
    %c0_i32 = arith.constant 0 : i32
    %c0_i32_0 = arith.constant 0 : i32
    return %arg1, %c0_i32 : i32, i32
  }
  func.func @transform_2(%arg0: i32, %arg1: i32, %arg2: i32) -> (i32, i32) {
    %c0_i32 = arith.constant 0 : i32
    %c0_i32_0 = arith.constant 0 : i32
    return %arg1, %c0_i32 : i32, i32
  }
  func.func @transform_3(%arg0: i32, %arg1: i32, %arg2: i32) -> (i32, i32, i32) {
    %c0_i32 = arith.constant 0 : i32
    return %arg0, %arg1, %arg2 : i32, i32, i32
  }
}

</mosaic_0001>

<bundles_post_ra>
// kernel: tpu_custom_call.1
= control target key start
LH: loop header
LB: loop body
LE: loop exit
PB: predicated region body
PF: predicated region fallthrough
CT: control target
= control target key end

     0   :  { %8 = vsyncpa [#allocation3], 0  ;;  %s720_s0 = inlined_call_operand.vmem [shape: f32[2,4,256], index: 0, kind: input, shape index: {}]   ;;  %s721_s1 = inlined_call_operand.vmem [shape: f32[8,4], index: 1, kind: input, shape index: {}]   ;;  %s722_s2 = inlined_call_operand.vmem [shape: f32[8,1], index: 2, kind: input, shape index: {}]   ;;  %s723_s3 = inlined_call_operand.hbm [shape: f32[2,8,256], index: 3, kind: output, shape index: {}]  }
   0x1   :  { %10 = vsyncpa [#allocation3 + $0x1], 0  ;;  %s617_s12 = smov 0   ;;  %s619_s13 = smov 0  }
   0x2   :  { %s621_s14 = smov 0   ;;  %s623_s15 = smov 0  }
   0x3   :  { %s625_s16 = smov 0   ;;  %s627_s17 = smov 0  }
   0x4 LB: > { %s438_s18 = sadd.s32 4294967295, %s594_s17   ;;  %s439_s19 = sadd.s32 4294967294, %s594_s17   ;;  %s594_s17 = sphi %s627_s17, %s16_s17   ;;  %s590_s16 = sphi %s625_s16, %s730_s16   ;;  %s586_s15 = sphi %s623_s15, %s729_s15   ;;  %s582_s14 = sphi %s621_s14, %s728_s14   ;;  %s578_s13 = sphi %s619_s13, %s727_s13   ;;  %s574_s12 = sphi %s617_s12, %s726_s12  }
   0x5   : > { %s35_s20 = sadd.s32 1, %s590_s16  ;;  %s126_s21 = sadd.s32 1, %s582_s14 }
   0x6   : > { %p37_p0 = scmp.ge.s32.totalorder %s35_s20, 2  ;;  %p136_p1 = scmp.ne.s32.totalorder %s582_s14, %s578_s13 }
   0x7   : > { %p137_p2 = scmp.eq.s32.totalorder %s438_s18, 1  ;;  %p142_p3 = scmp.ne.s32.totalorder %s578_s13, %s574_s12 }
   0x8   : > { %s732_s20 = smov (%p37_p0, %s35_s20), 0  ;;  %p143_p5 = scmp.eq.s32.totalorder %s439_s19, 1 }
   0x9   : > { %p657_p4 = por %p137_p2, %p136_p1  ;;  %s119_s23 = ssub.s32 %s590_s16, %s732_s20 }
   0xa   : > { %p444_p6 = scmp.ge.s32.totalorder %s594_s17, 1  ;;  %p124_p7 = scmp.eq.s32.totalorder %s119_s23, 0 }
   0xb   : > { %p664_p8 = por %p143_p5, %p142_p3  ;;  %p188_p9 = scmp.lt.s32.totalorder %s594_s17, 3 }
   0xc   : > { %s670_s25 = scalar_select %p124_p7, %s582_s14, %s126_s21  }
   0xd   : > { %p189_p10 = pnand %p444_p6, %p188_p9 }
   0xe   : > { %p225_p11 = scmp.lt.s32.totalorder (!%p189_p10), %s586_s15, 1  ;;  %s221_s8 = sand.u32 (!%p189_p10), 1, %s578_s13  }
   0xf   : > { %192 = sbr.rel (%p189_p10) target bundleno = 166 (0xa6), region = 32  ;;  %s445_s9 = sshll.u32 (!%p189_p10), %s221_s8, 4 }
  0x10   : > { %s458_s10 = sshll.u32 (!%p189_p10), %s586_s15, 4  ;;  %s223_s21 = scalar_lea.vmem (!%p189_p10), [#allocation2], %s445_s9 }
  0x11   : > { %s322_s19 = scalar_lea.hbm (!%p189_p10), %s723_s3, %s458_s10  ;;  %s324_s23 = sshll.u32 (!%p189_p10), %s223_s21, 4  ;;  %s325_s23 = int_to_ptr.vmem [resolvable:$true] %s324_s23 }
  0x12   : > { %s326_s26 = sshll.u32 (!%p189_p10), %s322_s19, 4  ;;  %s307_s27 = scalar_lea.sflag (!%p189_p10), [#allocation3], %s221_s8  ;;  %s327_s26 = int_to_ptr.hbm [resolvable:$true] %s326_s26 }
  0x13   : > { %s536_s4 = scalar_lea.hbm (!%p189_p10), %s723_s3, 32 }
  0x14   : > { %v245_v0 = vld [vmem:[%s722_s2] sm:$0xff]  ;;  %v596_v1 = vmov 0   ;;  %s226_s28 = scalar_select %p225_p11, %s586_s15, 1  ;;  %vm259_vm0 = vcmask 1043456   ;;  %vm255_vm1 = vcmask 31744  }
  0x15   : > { %515 = vset.pattern.permute.xlu0 %v596_v1  ;;  %v243_v3 = vld [vmem:[%s721_s1] sm:$0xff] }
  0x16   : > { %248 = vperm.xlu0 %515, %v245_v0   ;;  %s457_s29 = sshll.u32 %s226_s28, 3  ;;  %s530_s28 = sshra.s32 %s327_s26, 4  ;;  %s531_s28 = int_to_ptr.hbm [resolvable:$true] %s530_s28 }
  0x17   : > { %s232_s5 = scalar_lea.vmem %s720_s0, %s457_s29  ;;  %s532_s15 = scalar_lea.hbm %s531_s28, 16 }
  0x18   : > { %v244_v2 = vld [vmem:[%s232_s5] sm:$0xff]  ;;  %p533_p12 = scmp.ne.s32.totalorder %s531_s28, %s532_s15  ;;  %p537_p1 = scmp.lt.s32.totalorder %s531_s28, %s723_s3 }
  0x19   : > { %252 = vst [vmem:[#allocation1] ss:$2 sm:$0xff] %v244_v2  ;;  %p538_p2 = scmp.lt.s32.totalorder %s536_s4, %s532_s15 }
  0x1a   : > { %p534_p13 = pnand %p533_p12, %p657_p4 }
  0x1b   : > { %p539_p3 = por %p538_p2, %p537_p1 }
  0x1c   : > { %p535_p0 = pneg %p534_p13 }
  0x1e   : > { %p540_p5 = pnand %p539_p3, %p535_p0 }
  0x20   : > { %v253_v4 = vld.sshfl [vmem:[#allocation1] sm:$0xff pattern:$0x75316420]  ;;  %v254_v5 = vld.sshfl [vmem:[#allocation1 + $0x8] sm:$0xff pattern:$0x75316420] }
  0x21   : > { %448 = vmatpush.msk.msra.mxu0 %vm259_vm0, %v253_v4  ;;  %450 = vmatpush.msk.msra.mxu1 %vm259_vm0, %v254_v5 }
  0x22   : > { %449 = vmatmul.msk.f32.vlgmr.msra.gmra.mxu0 %vm255_vm1, %v243_v3  ;;  %451 = vmatmul.msk.f32.vlgmr.msra.gmra.mxu1 %vm255_vm1, %v243_v3 }
  0x88   : > { %v249_v6 = vpop.permute.xlu0 %248 }
  0x9f   : > { %v281_v7 = vpop.f32.mrf.mxu0  ;;  %v301_v8 = vpop.f32.mrf.mxu1 }
  0xa0   : > { %v282_v9 = vadd.f32 %v281_v7, %v249_v6  ;;  %v302_v10 = vadd.f32 %v301_v8, %v249_v6 }
  0xa2   : > { %304 = vst [vmem:[%s223_s21] sm:$0xff] %v282_v9 }
  0xa3   : > { %305 = vst [vmem:[%s223_s21 + $0x8] sm:$0xff] %v302_v10 }
  0xa4   : > { %543 = shalt.err (!%p540_p5)
}
  0xa5   : > { %459 = dma.vmem_to_hbm [thread:$0]  (%p657_p4), %s325_s23, 256, %s327_s26, %s307_s27  }
  0xa6 PF: > { %p465_p6 = scmp.ge.s32.totalorder %s594_s17, 2  ;;  %s338_s7 = sand.u32 1, %s574_s12  }
  0xa7   : > { %s339_s8 = scalar_lea.sflag [#allocation3], %s338_s7 }
  0xa8   : > { %p462_p7 = pnand %p465_p6, %p664_p8 }
  0xaa   : > { %p463_p9 = pneg %p462_p7 }
  0xac   : > { %569 = dma.done.wait (%p463_p9), %s339_s8, 256  }
  0xad   : > { %571 = vsyncadd (%p463_p9), %s339_s8, 4294967040  ;;  %s16_s17 = sadd.s32 1, %s594_s17   ;;  %s726_s12 = smov %s578_s13 }
  0xae   : > { %p13_p10 = scmp.ge.s32.totalorder %s16_s17, 4   ;;  %s727_s13 = smov %s582_s14 }
  0xaf   : > { %s728_s14 = smov %s670_s25  ;;  %s729_s15 = smov %s590_s16 }
  0xb0   : > { %s730_s16 = smov %s732_s20  ;;  %15 = sbr.rel (!%p13_p10) target bundleno = 4 (0x4), region = 73 }
  0xb5   :  { %345 = vsyncpa [#allocation3], 1 }
  0xb6   :  { %347 = vsyncpa [#allocation3 + $0x1], 1 }

</bundles_post_ra>
